<compile_context>
chip_gen: v7x
topology: tpu7x:2x2x1
jax: 0.10.0
libtpu: 0.0.40
codegen_flags: <defaults>
</compile_context>

<pallas_src>
from typing import NamedTuple

import jax
import jax.numpy as jnp
from jax.experimental import pallas as pl
from jax.experimental.pallas import tpu as pltpu


def _round_up(x, m):
    return ((x + m - 1) // m) * m


def _pick_tile(dim, max_tile, align):
    """Tile size: multiple of `align`, <= max(max_tile, padded dim), with
    bounded padding waste (prefer exact divisors of the aligned dim)."""
    padded = _round_up(max(dim, 1), align)
    if padded <= max_tile:
        return padded
    t = (max_tile // align) * align
    while t >= align:
        if padded % t == 0:
            return t
        t -= align
    n = -(-padded // max_tile)            # even-split fallback
    return _round_up(-(-padded // n), align)


# ----------------------------- Pallas kernels ------------------------------ #
def _fc_kernel_f32(x_ref, w_ref, b_ref, o_ref):
    """y = leaky_relu(x @ W_t + b, 0.2). f32 output: accumulate in-place in the
    resident output tile (no scratch).

    x_ref: (tm, tk), w_ref: (tk, tn) pre-transposed weight, b_ref: (1, tn) f32,
    o_ref: (tm, tn) f32, resident across the K grid axis.
    """
    k = pl.program_id(2)
    part = jnp.dot(x_ref[...], w_ref[...], preferred_element_type=jnp.float32)

    @pl.when(k == 0)
    def _():
        o_ref[...] = part

    @pl.when(k > 0)
    def _():
        o_ref[...] += part

    @pl.when(k == pl.num_programs(2) - 1)
    def _():
        y = o_ref[...] + b_ref[...]
        # leaky_relu slope 0.2: max(y, 0.2*y)  (2 VPU ops vs cmp+sel+mul)
        o_ref[...] = jnp.maximum(y, 0.2 * y)


def _fc_kernel_acc(x_ref, w_ref, b_ref, o_ref, acc_ref):
    """Same computation, with an f32 VMEM accumulator for non-f32 outputs."""
    k = pl.program_id(2)
    part = jnp.dot(x_ref[...], w_ref[...], preferred_element_type=jnp.float32)

    @pl.when(k == 0)
    def _():
        acc_ref[...] = part

    @pl.when(k > 0)
    def _():
        acc_ref[...] += part

    @pl.when(k == pl.num_programs(2) - 1)
    def _():
        y = acc_ref[...] + b_ref[...]
        o_ref[...] = jnp.maximum(y, 0.2 * y).astype(o_ref.dtype)


# ----------------------- parameter prep (one-time) ------------------------- #
def spectral_normalize(w, u0, n_power_iterations=1, eps=1e-12):
    """Mirror torch.nn.utils.spectral_norm forward-time weight computation."""
    u = u0
    v = None
    for _ in range(n_power_iterations):
        v = w.T @ u
        v = v / (jnp.linalg.norm(v) + eps)
        u = w @ v
        u = u / (jnp.linalg.norm(u) + eps)
    sigma = jnp.dot(u, w @ v)
    return w / sigma


class FCParams(NamedTuple):
    w_t: jax.Array   # (Kp, Np) transposed, padded, spectrally-normalized, MXU dtype
    b: jax.Array     # (1, Np) f32 padded bias
    cin: int
    cout: int
    tn: int
    tk: int


def prepare_fc_params(w, b, u0, *, n_power_iterations=1,
                      mxu_dtype=jnp.bfloat16, tn_max=256, tk_max=1024):
    """One-time weight preprocessing: spectral norm, transpose to (Cin, Cout)
    (fused with /sigma), pad to lane-aligned tiles, cast to the MXU dtype."""
    cout, cin = w.shape
    tn = _pick_tile(cout, tn_max, 128)
    tk = _pick_tile(cin, tk_max, 128)
    np_ = _round_up(cout, tn)
    kp = _round_up(cin, tk)

    w_sn = spectral_normalize(w, u0, n_power_iterations=n_power_iterations)
    w_t = jnp.pad(w_sn.T, ((0, kp - cin), (0, np_ - cout))).astype(mxu_dtype)
    b_p = jnp.pad(b, (0, np_ - cout)).reshape(1, np_).astype(jnp.float32)
    return FCParams(w_t=w_t, b=b_p, cin=cin, cout=cout, tn=tn, tk=tk)


# ------------------------------- forward ----------------------------------- #
def fc_forward(params: FCParams, x, *, tm_max=512):
    """x: (B, Cin) -> leaky_relu(x @ W_sn^T + b, 0.2) of shape (B, Cout)."""
    B, cin = x.shape
    assert cin == params.cin, "weight / input feature mismatch"
    kp, np_ = params.w_t.shape
    tk, tn = params.tk, params.tn
    mxu_dtype = params.w_t.dtype
    out_dtype = x.dtype

    # Sublane alignment for the M dim: 16 for 2-byte MXU inputs, else 8.
    sub = 16 if jnp.dtype(mxu_dtype).itemsize == 2 else 8
    tm = _pick_tile(B, tm_max, sub)
    mp = _round_up(B, tm)

    # v7x has 2 TensorCores: if the parallel (M, N) grid would be 1x1, split N
    # so both cores get work (tn stays a multiple of 128).
    tn_run = tn
    if mp // tm == 1 and np_ // tn == 1 and tn % 256 == 0:
        tn_run = tn // 2

    grid = (mp // tm, np_ // tn_run, kp // tk)

    # Per-call activation prep only (weight prep is hoisted).  Zero K-padding
    # contributes 0 to the dot; padded N columns are sliced off below.
    xp = jnp.pad(x, ((0, mp - B), (0, kp - cin))).astype(mxu_dtype)

    use_direct = (out_dtype == jnp.float32)
    kernel = _fc_kernel_f32 if use_direct else _fc_kernel_acc
    scratch = [] if use_direct else [pltpu.VMEM((tm, tn_run), jnp.float32)]

    in_b = jnp.dtype(mxu_dtype).itemsize
    out_b = jnp.dtype(out_dtype).itemsize
    vmem_est = (2 * tm * tk * in_b + 2 * tk * tn_run * in_b + 2 * tn_run * 4
                + 2 * tm * tn_run * out_b
                + (0 if use_direct else tm * tn_run * 4))
    # Cap at 48 MiB (safe on v7x's 64 MiB VMEM); the explicit limit also lifts
    # v5e's 16 MiB scoped default so larger tiles can double-buffer.
    vmem_limit = int(min(max(2 * vmem_est, 32 * 2 ** 20), 48 * 2 ** 20))

    out_padded = pl.pallas_call(
        kernel,
        out_shape=jax.ShapeDtypeStruct((mp, np_), out_dtype),
        grid_spec=pltpu.PrefetchScalarGridSpec(
            num_scalar_prefetch=0,
            grid=grid,
            in_specs=[
                pl.BlockSpec((tm, tk), lambda i, j, k: (i, k)),      # x tile
                pl.BlockSpec((tk, tn_run), lambda i, j, k: (k, j)),  # W^T tile
                pl.BlockSpec((1, tn_run), lambda i, j, k: (0, j)),   # bias tile
            ],
            out_specs=pl.BlockSpec((tm, tn_run), lambda i, j, k: (i, j)),
            scratch_shapes=scratch,
        ),
        compiler_params=pltpu.CompilerParams(
            dimension_semantics=("parallel", "parallel", "arbitrary"),
            vmem_limit_bytes=vmem_limit,
        ),
    )(xp, params.w_t, params.b)

    return out_padded[:B, :params.cout]


# --------------------------------- main ------------------------------------ #
if __name__ == "__main__":
    key = jax.random.PRNGKey(0)
    k_x, k_w, k_b, k_u = jax.random.split(key, 4)

    batch = 8
    in_channels = 32
    out_channels = 64

    # Deterministic synthetic parameters (nn.Linear shapes).
    x = jax.random.normal(k_x, (batch, in_channels), dtype=jnp.float32)
    w_orig = jax.random.normal(k_w, (out_channels, in_channels), dtype=jnp.float32) * 0.1
    b = jax.random.normal(k_b, (out_channels,), dtype=jnp.float32) * 0.1
    u0 = jax.random.normal(k_u, (out_channels,), dtype=jnp.float32)
    u0 = u0 / (jnp.linalg.norm(u0) + 1e-12)

    # One-time parameter prep: spectral norm + transpose + pad + bf16 cast.
    params = prepare_fc_params(w_orig, b, u0, n_power_iterations=1)

    out = fc_forward(params, x)
    jax.block_until_ready(out)

    # Reference in plain JAX (f32); tolerance loosened for the bf16 MXU path.
    w_sn = spectral_normalize(w_orig, u0, n_power_iterations=1)
    ref = x @ w_sn.T + b
    ref = jnp.where(ref >= 0.0, ref, 0.2 * ref)
    assert out.shape == (batch, out_channels)
    assert jnp.allclose(out, ref, atol=3e-2, rtol=3e-2), (
        float(jnp.max(jnp.abs(out - ref))))

    print("KERNEL_OK")
</pallas_src>

<mosaic_0001>
module attributes {stable_mosaic.version = 11 : i64} {
  func.func @_fc_kernel_f32(%arg0: i32, %arg1: i32, %arg2: i32, %arg3: memref<16x128xbf16, #tpu.memory_space<vmem>>, %arg4: memref<128x128xbf16, #tpu.memory_space<vmem>>, %arg5: memref<1x128xf32, #tpu.memory_space<vmem>>, %arg6: memref<16x128xf32, #tpu.memory_space<vmem>>) attributes {dimension_semantics = [#tpu.dimension_semantics<parallel>, #tpu.dimension_semantics<parallel>, #tpu.dimension_semantics<arbitrary>], iteration_bounds = array<i64: 1, 1, 1>, scalar_prefetch = 0 : i64, scratch_operands = 0 : i64, tpu.core_type = #tpu.core_type<tc>, window_params = [{transform_indices = @transform_0, window_bounds = array<i64: 16, 128>}, {transform_indices = @transform_1, window_bounds = array<i64: 128, 128>}, {transform_indices = @transform_2, window_bounds = array<i64: 1, 128>}, {transform_indices = @transform_3, window_bounds = array<i64: 16, 128>}]} {
    %c0 = arith.constant 0 : index
    %c0_0 = arith.constant 0 : index
    %0 = vector.load %arg3[%c0, %c0_0] : memref<16x128xbf16, #tpu.memory_space<vmem>>, vector<16x128xbf16>
    %c0_1 = arith.constant 0 : index
    %c0_2 = arith.constant 0 : index
    %1 = vector.load %arg4[%c0_1, %c0_2] : memref<128x128xbf16, #tpu.memory_space<vmem>>, vector<128x128xbf16>
    %cst = arith.constant dense<0.000000e+00> : vector<16x128xf32>
    %2 = tpu.matmul %0, %1, %cst {dimension_numbers = #tpu.dot_dimension_numbers<[1], [0], [0], [1], [0, 0, 1, 1], [], []>} : vector<16x128xbf16>, vector<128x128xbf16>, vector<16x128xf32> -> vector<16x128xf32>
    %c0_i32 = arith.constant 0 : i32
    %3 = arith.cmpi eq, %arg2, %c0_i32 : i32
    %4 = arith.extui %3 : i1 to i32
    %c0_i32_3 = arith.constant 0 : i32
    %5 = arith.cmpi ne, %4, %c0_i32_3 : i32
    scf.if %5 {
      %c0_8 = arith.constant 0 : index
      %c0_9 = arith.constant 0 : index
      %12 = vector.load %arg6[%c0_8, %c0_9] : memref<16x128xf32, #tpu.memory_space<vmem>>, vector<16x128xf32>
      tpu.vector_store %arg6[%c0_8, %c0_9], %2 {strides = array<i32>} : memref<16x128xf32, #tpu.memory_space<vmem>>, vector<16x128xf32>,
    } else {
    }
    %c0_i32_4 = arith.constant 0 : i32
    %6 = arith.cmpi sgt, %arg2, %c0_i32_4 : i32
    %7 = arith.extui %6 : i1 to i32
    %c0_i32_5 = arith.constant 0 : i32
    %8 = arith.cmpi ne, %7, %c0_i32_5 : i32
    scf.if %8 {
      %c0_8 = arith.constant 0 : index
      %c0_9 = arith.constant 0 : index
      %12 = vector.load %arg6[%c0_8, %c0_9] : memref<16x128xf32, #tpu.memory_space<vmem>>, vector<16x128xf32>
      %13 = arith.addf %12, %2 : vector<16x128xf32>
      %c0_10 = arith.constant 0 : index
      %c0_11 = arith.constant 0 : index
      %14 = vector.load %arg6[%c0_10, %c0_11] : memref<16x128xf32, #tpu.memory_space<vmem>>, vector<16x128xf32>
      tpu.vector_store %arg6[%c0_10, %c0_11], %13 {strides = array<i32>} : memref<16x128xf32, #tpu.memory_space<vmem>>, vector<16x128xf32>,
    } else {
    }
    %c0_i32_6 = arith.constant 0 : i32
    %9 = arith.cmpi eq, %arg2, %c0_i32_6 : i32
    %10 = arith.extui %9 : i1 to i32
    %c0_i32_7 = arith.constant 0 : i32
    %11 = arith.cmpi ne, %10, %c0_i32_7 : i32
    scf.if %11 {
      %c0_8 = arith.constant 0 : index
      %c0_9 = arith.constant 0 : index
      %12 = vector.load %arg6[%c0_8, %c0_9] : memref<16x128xf32, #tpu.memory_space<vmem>>, vector<16x128xf32>
      %c0_10 = arith.constant 0 : index
      %c0_11 = arith.constant 0 : index
      %13 = vector.load %arg5[%c0_10, %c0_11] : memref<1x128xf32, #tpu.memory_space<vmem>>, vector<1x128xf32>
      %14 = vector.broadcast %13 : vector<1x128xf32> to vector<16x128xf32>
      %15 = arith.addf %12, %14 : vector<16x128xf32>
      %cst_12 = arith.constant 2.000000e-01 : f32
      %16 = vector.broadcast %cst_12 : f32 to vector<16x128xf32>
      %17 = arith.mulf %16, %15 : vector<16x128xf32>
      %18 = arith.maximumf %15, %17 : vector<16x128xf32>
      %c0_13 = arith.constant 0 : index
      %c0_14 = arith.constant 0 : index
      %19 = vector.load %arg6[%c0_13, %c0_14] : memref<16x128xf32, #tpu.memory_space<vmem>>, vector<16x128xf32>
      tpu.vector_store %arg6[%c0_13, %c0_14], %18 {strides = array<i32>} : memref<16x128xf32, #tpu.memory_space<vmem>>, vector<16x128xf32>,
    } else {
    }
    return
  }
  func.func @transform_0(%arg0: i32, %arg1: i32, %arg2: i32) -> (i32, i32) {
    %c0_i32 = arith.constant 0 : i32
    return %arg0, %arg2 : i32, i32
  }
  func.func @transform_1(%arg0: i32, %arg1: i32, %arg2: i32) -> (i32, i32) {
    %c0_i32 = arith.constant 0 : i32
    return %arg2, %arg1 : i32, i32
  }
  func.func @transform_2(%arg0: i32, %arg1: i32, %arg2: i32) -> (i32, i32) {
    %c0_i32 = arith.constant 0 : i32
    %c0_i32_0 = arith.constant 0 : i32
    return %c0_i32, %arg1 : i32, i32
  }
  func.func @transform_3(%arg0: i32, %arg1: i32, %arg2: i32) -> (i32, i32) {
    %c0_i32 = arith.constant 0 : i32
    return %arg0, %arg1 : i32, i32
  }
}

</mosaic_0001>

<bundles_post_ra>
// kernel: tpu_custom_call.1
= control target key start
LH: loop header
LB: loop body
LE: loop exit
PB: predicated region body
PF: predicated region fallthrough
CT: control target
= control target key end

     0   :  { %8 = vsyncpa [#allocation3], 0  ;;  %s408_s0 = inlined_call_operand.hbm [shape: bf16[16,128], index: 0, kind: input, shape index: {}]   ;;  %s409_s1 = inlined_call_operand.hbm [shape: bf16[128,128], index: 1, kind: input, shape index: {}]   ;;  %s410_s2 = inlined_call_operand.vmem [shape: f32[1,128], index: 2, kind: input, shape index: {}]   ;;  %s411_s3 = inlined_call_operand.hbm [shape: f32[16,128], index: 3, kind: output, shape index: {}]  }
   0x1   :  { %9 = vsyncpa [#allocation6], 0 }
   0x2   :  { %10 = vsyncpa [#allocation4], 0  ;;  %s340_s12 = smov [#allocation2]   ;;  %s268_s16 = scalar_lea.hbm %s408_s0, 128 }
   0x3   :  { %s16_s13 = sshll.u32 %s340_s12, 4  ;;  %p269_p0 = scmp.ne.s32.totalorder %s408_s0, %s268_s16  ;;  %s17_s13 = int_to_ptr.vmem [resolvable:$true] %s16_s13 }
   0x4   :  { %p272_p1 = scmp.lt.u32.totalorder %s268_s16, %s408_s0 }
   0x6   :  { %p274_p2 = pnand %p272_p1, %p269_p0 }
   0x8   :  { %277 = shalt.err (!%p274_p2)
}
   0x9   :  { %s278_s21 = scalar_lea.vmem %s17_s13, 128  ;;  %p283_p4 = scmp.lt.s32.totalorder %s17_s13, %s17_s13 }
   0xa   :  { %p279_p3 = scmp.ne.s32.totalorder %s17_s13, %s278_s21  ;;  %p284_p5 = scmp.lt.s32.totalorder %s278_s21, %s278_s21 }
   0xc   :  { %p285_p6 = por %p284_p5, %p283_p4 }
   0xe   :  { %p286_p7 = pnand %p285_p6, %p279_p3 }
  0x10   :  { %289 = shalt.err (!%p286_p7)
}
  0x11   :  { %s341_s22 = smov 64   ;;  %s342_s23 = smov 4  }
  0x12   :  { %22 = dma.hbm_to_vmem [thread:$0]  %s408_s0, 128, %s17_s13, [#allocation3], %s341_s22, %s341_s22, %s342_s23  }
  0x13   :  { %s343_s26 = smov [#allocation5]   ;;  %s290_s30 = scalar_lea.hbm %s409_s1, 1024 }
  0x14   :  { %s28_s27 = sshll.u32 %s343_s26, 4  ;;  %p291_p8 = scmp.ne.s32.totalorder %s409_s1, %s290_s30  ;;  %s29_s27 = int_to_ptr.vmem [resolvable:$true] %s28_s27 }
  0x15   :  { %p294_p9 = scmp.lt.u32.totalorder %s290_s30, %s409_s1 }
  0x17   :  { %p296_p10 = pnand %p294_p9, %p291_p8 }
  0x19   :  { %299 = shalt.err (!%p296_p10)
}
  0x1a   :  { %s300_s8 = scalar_lea.vmem %s29_s27, 1024  ;;  %p305_p12 = scmp.lt.s32.totalorder %s29_s27, %s29_s27 }
  0x1b   :  { %p301_p11 = scmp.ne.s32.totalorder %s29_s27, %s300_s8  ;;  %p306_p13 = scmp.lt.s32.totalorder %s300_s8, %s300_s8 }
  0x1d   :  { %p307_p0 = por %p306_p13, %p305_p12 }
  0x1f   :  { %p308_p1 = pnand %p307_p0, %p301_p11 }
  0x21   :  { %311 = shalt.err (!%p308_p1)
}
  0x22   :  { %34 = dma.hbm_to_vmem [thread:$0]  %s409_s1, 1024, %s29_s27, [#allocation6], %s341_s22, %s341_s22, %s342_s23  }
  0x23   :  { %334 = dma.done.wait [#allocation3], 128  }
  0x24   :  { %335 = vsyncadd [#allocation3], 4294967168 }
  0x25   :  { %336 = dma.done.wait [#allocation6], 1024  }
  0x26   :  { %337 = vsyncadd [#allocation6], 4294966272  ;;  %v344_v0 = vmov 0.0   ;;  %vm345_vm0 = vmmov 0   ;;  %v259_v1 = vld [vmem:[#allocation5] sm:$0xff]   ;;  %v260_v2 = vld [vmem:[#allocation5 + $0x8] sm:$0xff]  }
  0x27   :  { %230 = vmatprep.subr.bf16.mxu0 %v344_v0  ;;  %246 = vmatprep.mubr.msk.bf16.mxu0 %vm345_vm0, %v344_v0  ;;  %v261_v3 = vld [vmem:[#allocation5 + $0x10] sm:$0xff]   ;;  %v262_v4 = vld [vmem:[#allocation5 + $0x18] sm:$0xff]   ;;  %v263_v5 = vld [vmem:[#allocation5 + $0x20] sm:$0xff]   ;;  %s346_s11 = smov [#allocation7]  }
  0x28   :  { %231 = vmatpush3.bf16.msra.mxu0 %v259_v1  ;;  %v264_v6 = vld [vmem:[#allocation5 + $0x28] sm:$0xff]   ;;  %v265_v7 = vld [vmem:[#allocation5 + $0x30] sm:$0xff]   ;;  %v266_v8 = vld [vmem:[#allocation5 + $0x38] sm:$0xff]   ;;  %s198_s12 = sshll.u32 %s346_s11, 4  ;;  %s199_s12 = int_to_ptr.vmem [resolvable:$true] %s198_s12 }
  0x29   :  { %232 = vmatprep.subr.bf16.mxu0 %v344_v0  ;;  %v267_v9 = vld [vmem:[#allocation2] sm:$0xff]   ;;  %s312_s13 = scalar_lea.vmem %s199_s12, 256  ;;  %p317_p3 = scmp.lt.s32.totalorder %s199_s12, %s199_s12 }
  0x2a   :  { %v220_v10 = vld [vmem:[%s410_s2] ss:$0 sm:$0xff]  ;;  %p313_p2 = scmp.ne.s32.totalorder %s199_s12, %s312_s13  ;;  %p318_p4 = scmp.lt.s32.totalorder %s312_s13, %s312_s13 }
  0x2c   :  { %233 = vmatpush3.bf16.msra.mxu0 %v260_v2  ;;  %p319_p5 = por %p318_p4, %p317_p3 }
  0x2d   :  { %234 = vmatprep.subr.bf16.mxu0 %v344_v0 }
  0x2e   :  { %p320_p6 = pnand %p319_p5, %p313_p2 }
  0x30   :  { %235 = vmatpush3.bf16.msra.mxu0 %v261_v3 }
  0x31   :  { %236 = vmatprep.subr.bf16.mxu0 %v344_v0 }
  0x34   :  { %237 = vmatpush3.bf16.msra.mxu0 %v262_v4 }
  0x35   :  { %238 = vmatprep.subr.bf16.mxu0 %v344_v0 }
  0x38   :  { %239 = vmatpush3.bf16.msra.mxu0 %v263_v5 }
  0x39   :  { %240 = vmatprep.subr.bf16.mxu0 %v344_v0 }
  0x3c   :  { %241 = vmatpush3.bf16.msra.mxu0 %v264_v6 }
  0x3d   :  { %242 = vmatprep.subr.bf16.mxu0 %v344_v0 }
  0x40   :  { %243 = vmatpush3.bf16.msra.mxu0 %v265_v7 }
  0x41   :  { %244 = vmatprep.subr.bf16.mxu0 %v344_v0 }
  0x44   :  { %245 = vmatpush3.bf16.msra.mxu0 %v266_v8 }
  0x47   :  { %247 = vmatmul.mubr.bf16.vlgmr.msra.gmra.mrb[0].mxu0 %v267_v9 }
 0x11a   :  { %v150_v11 = vpop.f32.mrb[0].mxu0 }
 0x11b   :  { %v185_v12 = vadd.f32 %v220_v10, %v150_v11  ;;  %v248_v13 = vpop.f32.mrb[1].mxu0 }
 0x11c   :  { %v153_v14 = vpop.f32.mrb[2].mxu0 }
 0x11d   :  { %v187_v15 = vmul.f32 0.2, %v185_v12  ;;  %v186_v16 = vadd.f32 %v220_v10, %v153_v14  ;;  %v249_v17 = vpop.f32.mrb[3].mxu0 }
 0x11f   :  { %v189_v18 = vmax.f32 %v185_v12, %v187_v15  ;;  %v188_v19 = vmul.f32 0.2, %v186_v16 }
 0x121   :  { %191 = vst [vmem:[#allocation7] sm:$0xff] %v189_v18  ;;  %v190_v20 = vmax.f32 %v186_v16, %v188_v19 }
 0x123   :  { %192 = vst [vmem:[#allocation7 + $0x8] sm:$0xff] %v190_v20 }
 0x124   :  { %323 = shalt.err (!%p320_p6)
}
 0x125   :  { %s324_s15 = scalar_lea.hbm %s411_s3, 256 }
 0x126   :  { %p325_p7 = scmp.ne.s32.totalorder %s411_s3, %s324_s15  ;;  %p328_p8 = scmp.lt.u32.totalorder %s324_s15, %s411_s3 }
 0x128   :  { %p330_p9 = pnand %p328_p8, %p325_p7 }
 0x12a   :  { %333 = shalt.err (!%p330_p9)
}
 0x12b   :  { %s347_s20 = smov 128   ;;  %s348_s21 = smov 8  }
 0x12c   :  { %204 = dma.vmem_to_hbm [thread:$0]  %s199_s12, 256, %s411_s3, [#allocation4], %s347_s20, %s347_s20, %s348_s21  }
 0x12d   :  { %338 = dma.done.wait [#allocation4], 256  }
 0x12e   :  { %339 = vsyncadd [#allocation4], 4294967040 }
 0x12f   :  { %208 = vsyncpa [#allocation3], 1 }
 0x130   :  { %209 = vsyncpa [#allocation6], 1 }
 0x131   :  { %210 = vsyncpa [#allocation4], 1 }

</bundles_post_ra>
